<compile_context>
chip_gen: v7x
topology: tpu7x:2x2x1
jax: 0.10.0
libtpu: 0.0.40
codegen_flags: <defaults>
</compile_context>

<pallas_src>
import functools
import math

import jax
import jax.numpy as jnp
from jax import lax
from jax.experimental import pallas as pl
from jax.experimental.pallas import tpu as pltpu

_MIB = 1024 * 1024


def _rmsnorm_kernel(x_ref, w_ref, o_ref, *, eps: float, d_model: int):
    """Normalize one (tm, D) tile of independent rows."""
    x = x_ref[...].astype(jnp.float32)                       # (tm, D) f32
    ms = jnp.sum(x * x, axis=-1, keepdims=True) * (1.0 / d_model)
    inv_rms = lax.rsqrt(ms + eps)                            # (tm, 1), EUP
    w = w_ref[...].astype(jnp.float32)                       # (1, D), resident
    o_ref[...] = (x * inv_rms * w).astype(o_ref.dtype)


def _vmem_limit_bytes() -> int:
    """Per-generation scoped-VMEM limit to request from Mosaic."""
    try:
        cap = int(pltpu.get_tpu_info().vmem_capacity_bytes)
    except Exception:  # conservative fallback (covers v7x's 64 MiB / TC)
        cap = 64 * _MIB
    # Leave headroom for compiler-internal scratch:
    #   128 MiB chips (v5e/v6e) -> 64 MiB; 64 MiB/TC chips (v7x) -> 48 MiB.
    return max(16 * _MIB, min(cap - 16 * _MIB, 64 * _MIB))


def _sublane_align(*dtypes) -> int:
    """Native sublane packing: 8 rows for 4-byte, 16 for 2-byte, 32 for 1-byte."""
    min_bytes = min(jnp.dtype(d).itemsize for d in dtypes)
    return max(8, (8 * 4) // max(min_bytes, 1))


def _pick_tm(M: int, D: int, in_dtype, out_dtype, io_budget: int,
             min_split_bytes: int = 1 * _MIB) -> int:
    """Largest sublane-aligned row tile whose VMEM footprint fits the budget."""
    in_b = jnp.dtype(in_dtype).itemsize
    out_b = jnp.dtype(out_dtype).itemsize
    align = _sublane_align(in_dtype, out_dtype)
    # Per-row bytes: double-buffered input + output blocks, plus the in-kernel
    # f32 intermediates (the x.astype(f32) copy and one elementwise temp).
    per_row = 2 * D * (in_b + out_b) + 2 * D * 4
    tm = io_budget // max(per_row, 1)                  # byte-based cap
    tm = max(align, (tm // align) * align)
    if tm >= M:
        tm = M                                          # block == full dim is legal
        # Megacore balance: if one tile would hold everything but the problem
        # is big enough, split into two tiles so both TensorCores get work.
        if M > 2 * align and M * D * in_b > min_split_bytes:
            half = -(-M // 2)                           # ceil(M/2)
            half = -(-half // align) * align            # round up to alignment
            if half < M:
                tm = half
    return tm


def rmsnorm_forward(x: jax.Array, weight: jax.Array, eps: float = 1e-5,
                    tm_override: int | None = None) -> jax.Array:
    """RMSNorm over the last axis of x with gain vector `weight` (shape (D,))."""
    orig_shape = x.shape
    D = orig_shape[-1]
    assert weight.shape == (D,), "weight must have shape (d_model,)"

    M = math.prod(orig_shape[:-1]) if len(orig_shape) > 1 else 1
    x2 = x.reshape(M, D)
    w2 = weight.reshape(1, D)                           # lane-dense gain block

    vmem_limit = _vmem_limit_bytes()
    io_budget = int(0.70 * vmem_limit)                  # headroom for scratch
    tm = (tm_override if tm_override is not None
          else _pick_tm(M, D, x.dtype, x.dtype, io_budget))
    tm = min(tm, M)

    # Ragged last tile is handled by Pallas: partial reads, masked edge writes.
    grid = (pl.cdiv(M, tm),)

    out = pl.pallas_call(
        functools.partial(_rmsnorm_kernel, eps=float(eps), d_model=D),
        out_shape=jax.ShapeDtypeStruct((M, D), x.dtype),
        grid=grid,
        in_specs=[
            pl.BlockSpec((tm, D), lambda i: (i, 0)),    # x rows, pipelined
            pl.BlockSpec((1, D), lambda i: (0, 0)),     # gain, stays resident
        ],
        out_specs=pl.BlockSpec((tm, D), lambda i: (i, 0)),
        compiler_params=pltpu.CompilerParams(
            dimension_semantics=("parallel",),          # megacore-shardable rows
            vmem_limit_bytes=vmem_limit,
        ),
    )(x2, w2)

    return out.reshape(orig_shape)


def _rmsnorm_ref(x: jax.Array, weight: jax.Array, eps: float = 1e-5) -> jax.Array:
    xf = x.astype(jnp.float32)
    rms = jnp.sqrt(jnp.mean(xf * xf, axis=-1, keepdims=True) + eps)
    return (xf * weight.astype(jnp.float32) / rms).astype(x.dtype)


if __name__ == "__main__":
    key = jax.random.PRNGKey(0)
    k_x, k_w, k_x2, k_x3 = jax.random.split(key, 4)

    # --- Test 1: small shape matching the module (f32), auto tile sizing -----
    batch, seq, d_model = 2, 8, 32
    x = jax.random.normal(k_x, (batch, seq, d_model), dtype=jnp.float32)
    weight = 1.0 + 0.1 * jax.random.normal(k_w, (d_model,), dtype=jnp.float32)

    y = jax.block_until_ready(rmsnorm_forward(x, weight, eps=1e-5))
    y_ref = _rmsnorm_ref(x, weight, eps=1e-5)
    assert y.shape == x.shape
    assert jnp.allclose(y, y_ref, atol=1e-5, rtol=1e-5)

    # --- Test 2: multi-tile grid (forces grid > 1 + pipelining) --------------
    x2 = jax.random.normal(k_x2, (4, 64, 128), dtype=jnp.float32)
    w2 = 1.0 + 0.05 * jax.random.normal(k_w, (128,), dtype=jnp.float32)
    y2 = jax.block_until_ready(rmsnorm_forward(x2, w2, eps=1e-5, tm_override=16))
    assert jnp.allclose(y2, _rmsnorm_ref(x2, w2, eps=1e-5), atol=1e-5, rtol=1e-5)

    # --- Test 3: ragged row count (no wrapper pad) + bf16 input dtype --------
    x3 = jax.random.normal(k_x3, (3, 7, 128), dtype=jnp.bfloat16)   # M = 21, tm = 8
    y3 = jax.block_until_ready(rmsnorm_forward(x3, w2, eps=1e-5, tm_override=8))
    y3_ref = _rmsnorm_ref(x3, w2, eps=1e-5)
    assert y3.dtype == jnp.bfloat16
    assert jnp.allclose(y3.astype(jnp.float32), y3_ref.astype(jnp.float32),
                        atol=2e-2, rtol=2e-2)

    # --- Test 4: ragged row count on the auto-sizing path, f32 ---------------
    x4 = jax.random.normal(k_x, (5, 7, 64), dtype=jnp.float32)      # M = 35
    w4 = 1.0 + 0.05 * jax.random.normal(k_w, (64,), dtype=jnp.float32)
    y4 = jax.block_until_ready(rmsnorm_forward(x4, w4, eps=1e-5))
    assert jnp.allclose(y4, _rmsnorm_ref(x4, w4, eps=1e-5), atol=1e-5, rtol=1e-5)

    print("KERNEL_OK")
</pallas_src>

<mosaic_0001>
module attributes {stable_mosaic.version = 11 : i64} {
  func.func @_rmsnorm_kernel(%arg0: i32, %arg1: memref<16x32xf32, #tpu.memory_space<vmem>>, %arg2: memref<1x32xf32, #tpu.memory_space<vmem>>, %arg3: memref<16x32xf32, #tpu.memory_space<vmem>>) attributes {dimension_semantics = [#tpu.dimension_semantics<parallel>], iteration_bounds = array<i64: 1>, scalar_prefetch = 0 : i64, scratch_operands = 0 : i64, tpu.core_type = #tpu.core_type<tc>, window_params = [{transform_indices = @transform_0, window_bounds = array<i64: 16, 32>}, {pipeline_mode = #tpu.pipeline_mode<synchronous>, transform_indices = @transform_1, window_bounds = array<i64: 1, 32>}, {transform_indices = @transform_2, window_bounds = array<i64: 16, 32>}]} {
    %c0 = arith.constant 0 : index
    %c0_0 = arith.constant 0 : index
    %0 = vector.load %arg1[%c0, %c0_0] : memref<16x32xf32, #tpu.memory_space<vmem>>, vector<16x32xf32>
    %1 = arith.mulf %0, %0 : vector<16x32xf32>
    %cst = arith.constant dense<0.000000e+00> : vector<16xf32>
    %2 = vector.multi_reduction <add>, %1, %cst [1] : vector<16x32xf32> to vector<16xf32>
    %3 = vector.shape_cast %2 : vector<16xf32> to vector<16x1xf32>
    %cst_1 = arith.constant 3.125000e-02 : f32
    %4 = vector.broadcast %cst_1 : f32 to vector<16x1xf32>
    %5 = arith.mulf %3, %4 : vector<16x1xf32>
    %cst_2 = arith.constant 9.99999974E-6 : f32
    %6 = vector.broadcast %cst_2 : f32 to vector<16x1xf32>
    %7 = arith.addf %5, %6 : vector<16x1xf32>
    %8 = math.rsqrt %7 : vector<16x1xf32>
    %c0_3 = arith.constant 0 : index
    %c0_4 = arith.constant 0 : index
    %9 = vector.load %arg2[%c0_3, %c0_4] : memref<1x32xf32, #tpu.memory_space<vmem>>, vector<1x32xf32>
    %10 = vector.broadcast %8 : vector<16x1xf32> to vector<16x32xf32>
    %11 = arith.mulf %0, %10 : vector<16x32xf32>
    %12 = vector.broadcast %9 : vector<1x32xf32> to vector<16x32xf32>
    %13 = arith.mulf %11, %12 : vector<16x32xf32>
    %c0_5 = arith.constant 0 : index
    %c0_6 = arith.constant 0 : index
    %14 = vector.load %arg3[%c0_5, %c0_6] : memref<16x32xf32, #tpu.memory_space<vmem>>, vector<16x32xf32>
    tpu.vector_store %arg3[%c0_5, %c0_6], %13 {strides = array<i32>} : memref<16x32xf32, #tpu.memory_space<vmem>>, vector<16x32xf32>,
    return
  }
  func.func @transform_0(%arg0: i32) -> (i32, i32) {
    %c0_i32 = arith.constant 0 : i32
    %c0_i32_0 = arith.constant 0 : i32
    return %arg0, %c0_i32 : i32, i32
  }
  func.func @transform_1(%arg0: i32) -> (i32, i32) {
    %c0_i32 = arith.constant 0 : i32
    %c0_i32_0 = arith.constant 0 : i32
    %c0_i32_1 = arith.constant 0 : i32
    return %c0_i32, %c0_i32_0 : i32, i32
  }
  func.func @transform_2(%arg0: i32) -> (i32, i32) {
    %c0_i32 = arith.constant 0 : i32
    %c0_i32_0 = arith.constant 0 : i32
    return %arg0, %c0_i32 : i32, i32
  }
}

</mosaic_0001>

<bundles_post_ra>
// kernel: tpu_custom_call.1
= control target key start
LH: loop header
LB: loop body
LE: loop exit
PB: predicated region body
PF: predicated region fallthrough
CT: control target
= control target key end

     0   :  { %7 = vsyncpa [#allocation3], 0  ;;  %s186_s0 = inlined_call_operand.hbm [shape: f32[16,32], index: 0, kind: input, shape index: {}]   ;;  %s187_s1 = inlined_call_operand.vmem [shape: f32[1,32], index: 1, kind: input, shape index: {}]   ;;  %s188_s2 = inlined_call_operand.hbm [shape: f32[16,32], index: 2, kind: output, shape index: {}]  }
   0x1   :  { %8 = vsyncpa [#allocation4], 0  ;;  %s130_s9 = smov [#allocation2]   ;;  %s82_s13 = scalar_lea.hbm %s186_s0, 256 }
   0x2   :  { %s14_s10 = sshll.u32 %s130_s9, 4  ;;  %p83_p0 = scmp.ne.s32.totalorder %s186_s0, %s82_s13  ;;  %s15_s10 = int_to_ptr.vmem [resolvable:$true] %s14_s10 }
   0x3   :  { %p86_p1 = scmp.lt.u32.totalorder %s82_s13, %s186_s0 }
   0x5   :  { %p88_p2 = pnand %p86_p1, %p83_p0 }
   0x7   :  { %91 = shalt.err (!%p88_p2)
}
   0x8   :  { %s92_s18 = scalar_lea.vmem %s15_s10, 256  ;;  %p97_p4 = scmp.lt.s32.totalorder %s15_s10, %s15_s10 }
   0x9   :  { %p93_p3 = scmp.ne.s32.totalorder %s15_s10, %s92_s18  ;;  %p98_p5 = scmp.lt.s32.totalorder %s92_s18, %s92_s18 }
   0xb   :  { %p99_p6 = por %p98_p5, %p97_p4 }
   0xd   :  { %p100_p7 = pnand %p99_p6, %p93_p3 }
   0xf   :  { %103 = shalt.err (!%p100_p7)
}
  0x10   :  { %s131_s19 = smov 128   ;;  %s132_s20 = smov 8  }
  0x11   :  { %20 = dma.hbm_to_vmem [thread:$0]  %s186_s0, 256, %s15_s10, [#allocation3], %s131_s19, %s131_s19, %s132_s20  }
  0x12   :  { %126 = dma.done.wait [#allocation3], 256  }
  0x13   :  { %127 = vsyncadd [#allocation3], 4294967040  ;;  %v26_v0 = vld [vmem:[#allocation2] sm:$0xff]  ;;  %vm30_vm0 = vcmask 261120   ;;  %v27_v1 = vld [vmem:[#allocation2 + $0x8] sm:$0xff]  ;;  %s133_s24 = smov [#allocation5]  }
  0x14   :  { %v28_v2 = vmul.f32 %v26_v0, %v26_v0  ;;  %v29_v3 = vmul.f32 %v27_v1, %v27_v1  ;;  %v73_v13 = vld [vmem:[%s187_s1] ss:$0 sm:$0xff]  ;;  %s61_s25 = sshll.u32 %s133_s24, 4  ;;  %s62_s25 = int_to_ptr.vmem [resolvable:$true] %s61_s25 }
  0x15   :  { %s104_s26 = scalar_lea.vmem %s62_s25, 256  ;;  %p109_p9 = scmp.lt.s32.totalorder %s62_s25, %s62_s25 }
  0x16   :  { %v31_v4 = vsel %vm30_vm0, %v28_v2, 0.0  ;;  %v34_v5 = vsel %vm30_vm0, %v29_v3, 0.0  ;;  %p105_p8 = scmp.ne.s32.totalorder %s62_s25, %s104_s26  ;;  %p110_p10 = scmp.lt.s32.totalorder %s104_s26, %s104_s26 }
  0x17   :  { %32 = vadd.xlane.f32.xlu0 %v31_v4 }
  0x18   :  { %p111_p11 = por %p110_p10, %p109_p9 }
  0x1a   :  { %p112_p12 = pnand %p111_p11, %p105_p8 }
  0x1b   :  { %35 = vadd.xlane.f32.xlu0 %v34_v5 }
  0xa4   :  { %v33_v6 = vpop.xlane.xlu0 %32 }
  0xa5   :  { %v37_v7 = vmul.f32 0.03125, %v33_v6 }
  0xa7   :  { %v39_v8 = vadd.f32 1e-05, %v37_v7 }
  0xa8   :  { %v36_v9 = vpop.xlane.xlu0 %35 }
  0xa9   :  { %78 = vrsqrt.f32 %v39_v8  ;;  %v38_v10 = vmul.f32 0.03125, %v36_v9 }
  0xab   :  { %v40_v11 = vadd.f32 1e-05, %v38_v10 }
  0xad   :  { %80 = vrsqrt.f32 %v40_v11 }
  0xb3   :  { %v79_v12 = vpop.eup %78 }
  0xb4   :  { %v44_v14 = vmul.f32 %v79_v12, %v26_v0 }
  0xb6   :  { %v52_v15 = vmul.f32 %v73_v13, %v44_v14 }
  0xb7   :  { %v81_v16 = vpop.eup %80 }
  0xb8   :  { %v45_v17 = vmul.f32 %v81_v16, %v27_v1  ;;  %54 = vst.msk [vmem:[#allocation5] sm:$0xff] %vm30_vm0, %v52_v15 }
  0xba   :  { %v53_v18 = vmul.f32 %v73_v13, %v45_v17 }
  0xbc   :  { %55 = vst.msk [vmem:[#allocation5 + $0x8] sm:$0xff] %vm30_vm0, %v53_v18 }
  0xbd   :  { %115 = shalt.err (!%p112_p12)
}
  0xbe   :  { %s116_s28 = scalar_lea.hbm %s188_s2, 256 }
  0xbf   :  { %p117_p13 = scmp.ne.s32.totalorder %s188_s2, %s116_s28  ;;  %p120_p0 = scmp.lt.u32.totalorder %s116_s28, %s188_s2 }
  0xc1   :  { %p122_p1 = pnand %p120_p0, %p117_p13 }
  0xc3   :  { %125 = shalt.err (!%p122_p1)
}
  0xc4   :  { %67 = dma.vmem_to_hbm [thread:$0]  %s62_s25, 256, %s188_s2, [#allocation4], %s131_s19, %s131_s19, %s132_s20  }
  0xc5   :  { %128 = dma.done.wait [#allocation4], 256  }
  0xc6   :  { %129 = vsyncadd [#allocation4], 4294967040 }
  0xc7   :  { %71 = vsyncpa [#allocation3], 1 }
  0xc8   :  { %72 = vsyncpa [#allocation4], 1 }

</bundles_post_ra>
